<compile_context>
chip_gen: v6e
topology: v6e:2x2x1
jax: 0.10.0
libtpu: 0.0.40
codegen_flags: <defaults>
</compile_context>

<pallas_src>
import functools
import math

import jax
import jax.numpy as jnp
from jax import lax
from jax.experimental import pallas as pl
from jax.experimental.pallas import tpu as pltpu

MEAN = 0.0
STD = 1.0
P = 0.5

_LANE = 128
_MAX_ROW_TILE = 2048  # 2048 * 128 * 4B = 1 MiB per f32 block


def _s32(v):
    """Reinterpret an unsigned 32-bit constant as signed int32 (python int)."""
    v &= 0xFFFFFFFF
    return v - (1 << 32) if v >= (1 << 31) else v


_GOLD = _s32(0x9E3779B1)
_M1 = _s32(0x7FEB352D)
_M2 = _s32(0x846CA68B)
_STREAM = _s32(0x85EBCA6B)


def _lsr(x, s):
    """Logical shift-right for int32 values (arithmetic shift + mask)."""
    return (x >> s) & ((1 << (32 - s)) - 1)


def _mix32(x):
    """Murmur3-style 32-bit finalizer (good avalanche, pure int32 VPU ops)."""
    x = x ^ _lsr(x, 16)
    x = x * _M1
    x = x ^ _lsr(x, 15)
    x = x * _M2
    x = x ^ _lsr(x, 16)
    return x


def _gaussian_noise_kernel(seed_ref, apply_ref, x_ref, o_ref, *, mean, std, row_tile):
    j = pl.program_id(0)   # row-block index within the sample (outermost -> core split)
    b = pl.program_id(1)   # sample index

    apply = apply_ref[b] != 0

    @pl.when(jnp.logical_not(apply))
    def _():
        # Not selected by the Bernoulli(p) gate: pure passthrough copy.
        o_ref[...] = x_ref[...]

    @pl.when(apply)
    def _():
        half = row_tile // 2

        # Decorrelated per-sample key (multiplicative hash of the batch index).
        key = _mix32((seed_ref[0] + 1) ^ (b * _GOLD))

        # One full-128-lane (1, half, 128) element per Box-Muller *pair*;
        # the two outputs go to the top / bottom row halves of the block.
        row = lax.broadcasted_iota(jnp.int32, (1, half, _LANE), 1)
        col = lax.broadcasted_iota(jnp.int32, (1, half, _LANE), 2)
        ctr = ((j * half + row) << 7) | col        # unique per pair (128 = 2**7 lanes)

        bits1 = _mix32(ctr ^ key)
        bits2 = _mix32(ctr ^ key ^ _STREAM)

        # u1 in (0, 1] from 24 bits; theta in [0, 2*pi) directly from 24 bits.
        u1 = ((bits1 & 0x00FFFFFF).astype(jnp.float32) + 1.0) * jnp.float32(1.0 / 16777216.0)
        theta = (bits2 & 0x00FFFFFF).astype(jnp.float32) * jnp.float32(
            2.0 * math.pi / 16777216.0)

        # Box-Muller with a single trig polynomial:
        #   r     = std * sqrt(-2 ln u1)              (std folded into constant)
        #   c     = cos(theta)
        #   |s|   = sqrt(1 - c^2)  via x * rsqrt(x)   (EUP slot, not VALU)
        #   sign  = +1 if theta < pi else -1          (== u2 < 0.5)
        r = jnp.sqrt(jnp.float32(-2.0 * std * std) * jnp.log(u1))
        c = jnp.cos(theta)
        s2 = jnp.maximum(jnp.float32(1.0) - c * c, jnp.float32(1e-30))
        s_abs = s2 * lax.rsqrt(s2)
        s = jnp.where(theta < jnp.float32(math.pi), s_abs, -s_abs)

        n0 = r * c
        n1 = r * s
        if mean != 0.0:
            n0 = n0 + jnp.float32(mean)
            n1 = n1 + jnp.float32(mean)

        # Store each half directly (no concat, no extra (row_tile,128) temp).
        o_ref[:, :half, :] = (x_ref[:, :half, :].astype(jnp.float32) + n0).astype(o_ref.dtype)
        o_ref[:, half:, :] = (x_ref[:, half:, :].astype(jnp.float32) + n1).astype(o_ref.dtype)


def random_gaussian_noise(x, seed, apply_mask, mean=MEAN, std=STD):
    """x: (N, C, H, W). seed: int32 (1,). apply_mask: int32 (N,) per-sample gate."""
    N = x.shape[0]
    L = 1
    for d in x.shape[1:]:
        L *= int(d)

    # Lane/sublane-dense layout: each sample becomes a (rows_p, 128) slab with
    # rows_p a multiple of 8.  For typical CHW shapes this is a pure reshape
    # (no pad and no post-kernel slice -> no extra HBM passes).
    rows = -(-L // _LANE)
    rows_p = -(-rows // 8) * 8
    l_pad = rows_p * _LANE

    xf = x.reshape(N, L)
    if l_pad != L:
        xf = jnp.pad(xf, ((0, 0), (0, l_pad - L)))
    xf = xf.reshape(N, rows_p, _LANE)

    # Row tile: whole sample if it fits, else the largest multiple-of-8 divisor
    # of rows_p under the cap (so rows never get padded to a tile multiple);
    # fall back to a ragged last block (Pallas drops out-of-bounds writes).
    if rows_p <= _MAX_ROW_TILE:
        row_tile = rows_p
    else:
        row_tile = _MAX_ROW_TILE
        for cand in range(_MAX_ROW_TILE, 255, -8):
            if rows_p % cand == 0:
                row_tile = cand
                break
    grid_rows = -(-rows_p // row_tile)

    kernel = functools.partial(
        _gaussian_noise_kernel, mean=float(mean), std=float(std), row_tile=row_tile
    )

    cost = pl.CostEstimate(
        flops=12 * N * l_pad,
        transcendentals=2 * N * l_pad,
        bytes_accessed=2 * N * l_pad * int(x.dtype.itemsize),
    )

    out = pl.pallas_call(
        kernel,
        out_shape=jax.ShapeDtypeStruct(xf.shape, x.dtype),
        grid_spec=pltpu.PrefetchScalarGridSpec(
            num_scalar_prefetch=2,
            grid=(grid_rows, N),   # row blocks outermost -> v7x core split even when N == 1
            in_specs=[
                pl.BlockSpec(
                    (1, row_tile, _LANE),
                    lambda j, b, seed_ref, apply_ref: (b, j, 0),
                ),
            ],
            out_specs=pl.BlockSpec(
                (1, row_tile, _LANE),
                lambda j, b, seed_ref, apply_ref: (b, j, 0),
            ),
        ),
        compiler_params=pltpu.CompilerParams(
            dimension_semantics=("parallel", "parallel"),
            vmem_limit_bytes=32 * 1024 * 1024,
        ),
        cost_estimate=cost,
    )(seed, apply_mask, xf)

    if l_pad != L:
        out = out.reshape(N, l_pad)[:, :L]
    out = out.reshape(x.shape)
    # torch .squeeze(0): only drops the leading dim when it is size 1.
    return out[0] if out.shape[0] == 1 else out


if __name__ == "__main__":
    key = jax.random.PRNGKey(0)
    kx, kp = jax.random.split(key)

    # Small NCHW input consistent with an image-augmentation module.
    x = jax.random.normal(kx, (2, 4, 16, 16), dtype=jnp.float32)

    # Per-sample Bernoulli(p=0.5) selection computed as glue in plain JAX
    # (which samples get noise, matching kornia's per-sample gate); the noise
    # itself is generated in-kernel.
    apply_mask = (jax.random.uniform(kp, (x.shape[0],)) < P).astype(jnp.int32)
    seed = jnp.array([0], dtype=jnp.int32)

    out = jax.block_until_ready(random_gaussian_noise(x, seed, apply_mask))

    assert out.shape == x.shape and out.dtype == x.dtype
    for i in range(x.shape[0]):
        if int(apply_mask[i]) == 0:
            # Samples that were not selected must pass through unchanged.
            assert bool(jnp.allclose(out[i], x[i]))
        else:
            noise = out[i] - x[i]
            assert not bool(jnp.allclose(noise, 0.0))
            assert abs(float(noise.mean())) < 0.3
            assert abs(float(noise.std()) - 1.0) < 0.3
    print("KERNEL_OK")
</pallas_src>

<mosaic_0001>
module attributes {stable_mosaic.version = 11 : i64} {
  func.func @_gaussian_noise_kernel(%arg0: i32, %arg1: i32, %arg2: memref<1xi32, #tpu.memory_space<smem>>, %arg3: memref<2xi32, #tpu.memory_space<smem>>, %arg4: memref<1x8x128xf32, #tpu.memory_space<vmem>>, %arg5: memref<1x8x128xf32, #tpu.memory_space<vmem>>) attributes {dimension_semantics = [#tpu.dimension_semantics<parallel>, #tpu.dimension_semantics<parallel>], iteration_bounds = array<i64: 1, 2>, scalar_prefetch = 2 : i64, scratch_operands = 0 : i64, tpu.core_type = #tpu.core_type<tc>, window_params = [{transform_indices = @transform_0, window_bounds = array<i64: 1, 8, 128>}, {transform_indices = @transform_1, window_bounds = array<i64: 1, 8, 128>}]} {
    %0 = arith.index_cast %arg1 : i32 to index
    %1 = memref.load %arg3[%0] : memref<2xi32, #tpu.memory_space<smem>>
    %c0_i32 = arith.constant 0 : i32
    %2 = arith.cmpi ne, %1, %c0_i32 : i32
    %true = arith.constant true
    %3 = arith.xori %2, %true : i1
    %4 = arith.extui %3 : i1 to i32
    %c0_i32_0 = arith.constant 0 : i32
    %5 = arith.cmpi ne, %4, %c0_i32_0 : i32
    scf.if %5 {
      %c0 = arith.constant 0 : index
      %c0_2 = arith.constant 0 : index
      %c0_3 = arith.constant 0 : index
      %8 = vector.load %arg4[%c0, %c0_2, %c0_3] : memref<1x8x128xf32, #tpu.memory_space<vmem>>, vector<1x8x128xf32>
      %c0_4 = arith.constant 0 : index
      %c0_5 = arith.constant 0 : index
      %c0_6 = arith.constant 0 : index
      %9 = vector.load %arg5[%c0_4, %c0_5, %c0_6] : memref<1x8x128xf32, #tpu.memory_space<vmem>>, vector<1x8x128xf32>
      tpu.vector_store %arg5[%c0_4, %c0_5, %c0_6], %8 {strides = array<i32>} : memref<1x8x128xf32, #tpu.memory_space<vmem>>, vector<1x8x128xf32>,
    } else {
    }
    %6 = arith.extui %2 : i1 to i32
    %c0_i32_1 = arith.constant 0 : i32
    %7 = arith.cmpi ne, %6, %c0_i32_1 : i32
    scf.if %7 {
      %c0 = arith.constant 0 : index
      %8 = memref.load %arg2[%c0] : memref<1xi32, #tpu.memory_space<smem>>
      %c1_i32 = arith.constant 1 : i32
      %9 = arith.addi %8, %c1_i32 : i32
      %c-1640531535_i32 = arith.constant -1640531535 : i32
      %10 = arith.muli %arg1, %c-1640531535_i32 : i32
      %11 = arith.xori %9, %10 : i32
      %c16_i32 = arith.constant 16 : i32
      %12 = arith.shrsi %11, %c16_i32 : i32
      %c65535_i32 = arith.constant 65535 : i32
      %13 = arith.andi %12, %c65535_i32 : i32
      %14 = arith.xori %11, %13 : i32
      %c2146121005_i32 = arith.constant 2146121005 : i32
      %15 = arith.muli %14, %c2146121005_i32 : i32
      %c15_i32 = arith.constant 15 : i32
      %16 = arith.shrsi %15, %c15_i32 : i32
      %c131071_i32 = arith.constant 131071 : i32
      %17 = arith.andi %16, %c131071_i32 : i32
      %18 = arith.xori %15, %17 : i32
      %c-2073254261_i32 = arith.constant -2073254261 : i32
      %19 = arith.muli %18, %c-2073254261_i32 : i32
      %c16_i32_2 = arith.constant 16 : i32
      %20 = arith.shrsi %19, %c16_i32_2 : i32
      %c65535_i32_3 = arith.constant 65535 : i32
      %21 = arith.andi %20, %c65535_i32_3 : i32
      %22 = arith.xori %19, %21 : i32
      %23 = tpu.iota {dimensions = array<i32: 1>} : vector<1x4x128xi32>
      %24 = tpu.iota {dimensions = array<i32: 2>} : vector<1x4x128xi32>
      %c4_i32 = arith.constant 4 : i32
      %25 = arith.muli %arg0, %c4_i32 : i32
      %26 = vector.broadcast %25 : i32 to vector<1x4x128xi32>
      %27 = arith.addi %26, %23 : vector<1x4x128xi32>
      %c7_i32 = arith.constant 7 : i32
      %28 = vector.broadcast %c7_i32 : i32 to vector<1x4x128xi32>
      %29 = arith.shli %27, %28 : vector<1x4x128xi32>
      %30 = arith.ori %29, %24 : vector<1x4x128xi32>
      %31 = vector.broadcast %22 : i32 to vector<1x4x128xi32>
      %32 = arith.xori %30, %31 : vector<1x4x128xi32>
      %c16_i32_4 = arith.constant 16 : i32
      %33 = vector.broadcast %c16_i32_4 : i32 to vector<1x4x128xi32>
      %34 = arith.shrsi %32, %33 : vector<1x4x128xi32>
      %c65535_i32_5 = arith.constant 65535 : i32
      %35 = vector.broadcast %c65535_i32_5 : i32 to vector<1x4x128xi32>
      %36 = arith.andi %34, %35 : vector<1x4x128xi32>
      %37 = arith.xori %32, %36 : vector<1x4x128xi32>
      %c2146121005_i32_6 = arith.constant 2146121005 : i32
      %38 = vector.broadcast %c2146121005_i32_6 : i32 to vector<1x4x128xi32>
      %39 = arith.muli %37, %38 : vector<1x4x128xi32>
      %c15_i32_7 = arith.constant 15 : i32
      %40 = vector.broadcast %c15_i32_7 : i32 to vector<1x4x128xi32>
      %41 = arith.shrsi %39, %40 : vector<1x4x128xi32>
      %c131071_i32_8 = arith.constant 131071 : i32
      %42 = vector.broadcast %c131071_i32_8 : i32 to vector<1x4x128xi32>
      %43 = arith.andi %41, %42 : vector<1x4x128xi32>
      %44 = arith.xori %39, %43 : vector<1x4x128xi32>
      %c-2073254261_i32_9 = arith.constant -2073254261 : i32
      %45 = vector.broadcast %c-2073254261_i32_9 : i32 to vector<1x4x128xi32>
      %46 = arith.muli %44, %45 : vector<1x4x128xi32>
      %c16_i32_10 = arith.constant 16 : i32
      %47 = vector.broadcast %c16_i32_10 : i32 to vector<1x4x128xi32>
      %48 = arith.shrsi %46, %47 : vector<1x4x128xi32>
      %c65535_i32_11 = arith.constant 65535 : i32
      %49 = vector.broadcast %c65535_i32_11 : i32 to vector<1x4x128xi32>
      %50 = arith.andi %48, %49 : vector<1x4x128xi32>
      %51 = arith.xori %46, %50 : vector<1x4x128xi32>
      %52 = vector.broadcast %22 : i32 to vector<1x4x128xi32>
      %53 = arith.xori %30, %52 : vector<1x4x128xi32>
      %c-2048144789_i32 = arith.constant -2048144789 : i32
      %54 = vector.broadcast %c-2048144789_i32 : i32 to vector<1x4x128xi32>
      %55 = arith.xori %53, %54 : vector<1x4x128xi32>
      %c16_i32_12 = arith.constant 16 : i32
      %56 = vector.broadcast %c16_i32_12 : i32 to vector<1x4x128xi32>
      %57 = arith.shrsi %55, %56 : vector<1x4x128xi32>
      %c65535_i32_13 = arith.constant 65535 : i32
      %58 = vector.broadcast %c65535_i32_13 : i32 to vector<1x4x128xi32>
      %59 = arith.andi %57, %58 : vector<1x4x128xi32>
      %60 = arith.xori %55, %59 : vector<1x4x128xi32>
      %c2146121005_i32_14 = arith.constant 2146121005 : i32
      %61 = vector.broadcast %c2146121005_i32_14 : i32 to vector<1x4x128xi32>
      %62 = arith.muli %60, %61 : vector<1x4x128xi32>
      %c15_i32_15 = arith.constant 15 : i32
      %63 = vector.broadcast %c15_i32_15 : i32 to vector<1x4x128xi32>
      %64 = arith.shrsi %62, %63 : vector<1x4x128xi32>
      %c131071_i32_16 = arith.constant 131071 : i32
      %65 = vector.broadcast %c131071_i32_16 : i32 to vector<1x4x128xi32>
      %66 = arith.andi %64, %65 : vector<1x4x128xi32>
      %67 = arith.xori %62, %66 : vector<1x4x128xi32>
      %c-2073254261_i32_17 = arith.constant -2073254261 : i32
      %68 = vector.broadcast %c-2073254261_i32_17 : i32 to vector<1x4x128xi32>
      %69 = arith.muli %67, %68 : vector<1x4x128xi32>
      %c16_i32_18 = arith.constant 16 : i32
      %70 = vector.broadcast %c16_i32_18 : i32 to vector<1x4x128xi32>
      %71 = arith.shrsi %69, %70 : vector<1x4x128xi32>
      %c65535_i32_19 = arith.constant 65535 : i32
      %72 = vector.broadcast %c65535_i32_19 : i32 to vector<1x4x128xi32>
      %73 = arith.andi %71, %72 : vector<1x4x128xi32>
      %74 = arith.xori %69, %73 : vector<1x4x128xi32>
      %c16777215_i32 = arith.constant 16777215 : i32
      %75 = vector.broadcast %c16777215_i32 : i32 to vector<1x4x128xi32>
      %76 = arith.andi %51, %75 : vector<1x4x128xi32>
      %77 = arith.sitofp %76 : vector<1x4x128xi32> to vector<1x4x128xf32>
      %cst = arith.constant 1.000000e+00 : f32
      %78 = vector.broadcast %cst : f32 to vector<1x4x128xf32>
      %79 = arith.addf %77, %78 : vector<1x4x128xf32>
      %cst_20 = arith.constant 5.96046448E-8 : f32
      %80 = vector.broadcast %cst_20 : f32 to vector<1x4x128xf32>
      %81 = arith.mulf %79, %80 : vector<1x4x128xf32>
      %c16777215_i32_21 = arith.constant 16777215 : i32
      %82 = vector.broadcast %c16777215_i32_21 : i32 to vector<1x4x128xi32>
      %83 = arith.andi %74, %82 : vector<1x4x128xi32>
      %84 = arith.sitofp %83 : vector<1x4x128xi32> to vector<1x4x128xf32>
      %cst_22 = arith.constant 3.74507039E-7 : f32
      %85 = vector.broadcast %cst_22 : f32 to vector<1x4x128xf32>
      %86 = arith.mulf %84, %85 : vector<1x4x128xf32>
      %87 = math.log %81 : vector<1x4x128xf32>
      %cst_23 = arith.constant -2.000000e+00 : f32
      %88 = vector.broadcast %cst_23 : f32 to vector<1x4x128xf32>
      %89 = arith.mulf %88, %87 : vector<1x4x128xf32>
      %90 = math.sqrt %89 : vector<1x4x128xf32>
      %91 = math.cos %86 : vector<1x4x128xf32>
      %92 = arith.mulf %91, %91 : vector<1x4x128xf32>
      %cst_24 = arith.constant 1.000000e+00 : f32
      %93 = vector.broadcast %cst_24 : f32 to vector<1x4x128xf32>
      %94 = arith.subf %93, %92 : vector<1x4x128xf32>
      %cst_25 = arith.constant 1.000000e-30 : f32
      %95 = vector.broadcast %cst_25 : f32 to vector<1x4x128xf32>
      %96 = arith.maximumf %94, %95 : vector<1x4x128xf32>
      %97 = math.rsqrt %96 : vector<1x4x128xf32>
      %98 = arith.mulf %96, %97 : vector<1x4x128xf32>
      %cst_26 = arith.constant 3.14159274 : f32
      %99 = vector.broadcast %cst_26 : f32 to vector<1x4x128xf32>
      %100 = arith.cmpf olt, %86, %99 : vector<1x4x128xf32>
      %cst_27 = arith.constant 0.000000e+00 : f32
      %101 = vector.broadcast %cst_27 : f32 to vector<1x4x128xf32>
      %102 = arith.subf %101, %98 : vector<1x4x128xf32>
      %103 = arith.select %100, %98, %102 : vector<1x4x128xi1>, vector<1x4x128xf32>
      %104 = arith.mulf %90, %91 : vector<1x4x128xf32>
      %105 = arith.mulf %90, %103 : vector<1x4x128xf32>
      %c0_28 = arith.constant 0 : index
      %c0_29 = arith.constant 0 : index
      %c0_30 = arith.constant 0 : index
      %106 = vector.load %arg4[%c0_28, %c0_29, %c0_30] : memref<1x8x128xf32, #tpu.memory_space<vmem>>, vector<1x4x128xf32>
      %107 = arith.addf %106, %104 : vector<1x4x128xf32>
      %c0_31 = arith.constant 0 : index
      %c0_32 = arith.constant 0 : index
      %c0_33 = arith.constant 0 : index
      %108 = vector.load %arg5[%c0_31, %c0_32, %c0_33] : memref<1x8x128xf32, #tpu.memory_space<vmem>>, vector<1x4x128xf32>
      tpu.vector_store %arg5[%c0_31, %c0_32, %c0_33], %107 {strides = array<i32>} : memref<1x8x128xf32, #tpu.memory_space<vmem>>, vector<1x4x128xf32>,
      %c0_34 = arith.constant 0 : index
      %c4 = arith.constant 4 : index
      %c0_35 = arith.constant 0 : index
      %109 = vector.load %arg4[%c0_34, %c4, %c0_35] : memref<1x8x128xf32, #tpu.memory_space<vmem>>, vector<1x4x128xf32>
      %110 = arith.addf %109, %105 : vector<1x4x128xf32>
      %c0_36 = arith.constant 0 : index
      %c4_37 = arith.constant 4 : index
      %c0_38 = arith.constant 0 : index
      %111 = vector.load %arg5[%c0_36, %c4_37, %c0_38] : memref<1x8x128xf32, #tpu.memory_space<vmem>>, vector<1x4x128xf32>
      tpu.vector_store %arg5[%c0_36, %c4_37, %c0_38], %110 {strides = array<i32>} : memref<1x8x128xf32, #tpu.memory_space<vmem>>, vector<1x4x128xf32>,
    } else {
    }
    return
  }
  func.func @transform_0(%arg0: i32, %arg1: i32, %arg2: memref<1xi32, #tpu.memory_space<smem>>, %arg3: memref<2xi32, #tpu.memory_space<smem>>) -> (i32, i32, i32) {
    %c0_i32 = arith.constant 0 : i32
    %c0_i32_0 = arith.constant 0 : i32
    return %arg1, %arg0, %c0_i32 : i32, i32, i32
  }
  func.func @transform_1(%arg0: i32, %arg1: i32, %arg2: memref<1xi32, #tpu.memory_space<smem>>, %arg3: memref<2xi32, #tpu.memory_space<smem>>) -> (i32, i32, i32) {
    %c0_i32 = arith.constant 0 : i32
    %c0_i32_0 = arith.constant 0 : i32
    return %arg1, %arg0, %c0_i32 : i32, i32, i32
  }
}

</mosaic_0001>

<bundles_post_ra>
// kernel: tpu_custom_call.1
= control target key start
LH: loop header
LB: loop body
LE: loop exit
PB: predicated region body
PF: predicated region fallthrough
CT: control target
= control target key end

     0   :  { %s885_s0 = inlined_call_operand.<no memory space> [shape: s32[1], index: 0, kind: input, shape index: {}]   ;;  %s886_s1 = inlined_call_operand.vmem [shape: s32[2], index: 1, kind: input, shape index: {}]   ;;  %s887_s2 = inlined_call_operand.hbm [shape: f32[2,8,128], index: 2, kind: input, shape index: {}]   ;;  %s888_s3 = inlined_call_operand.hbm [shape: f32[2,8,128], index: 3, kind: output, shape index: {}]  }
   0x1   :  { %8 = sst [smem:[#allocation3]] %s885_s0  ;;  %s9_s16 = sshll.u32 %s886_s1, 4  ;;  %s10_s16 = int_to_ptr.vmem [resolvable:$true] %s9_s16 }
   0x2   :  { %s557_s17 = scalar_lea.vmem %s10_s16, 16  ;;  %p562_p1 = scmp.lt.s32.totalorder %s10_s16, %s10_s16 }
   0x3   :  { %p558_p0 = scmp.ne.s32.totalorder %s10_s16, %s557_s17  ;;  %p563_p2 = scmp.lt.s32.totalorder %s557_s17, %s557_s17 }
   0x5   :  { %p564_p3 = por %p563_p2, %p562_p1 }
   0x7   :  { %p565_p4 = pnand %p564_p3, %p558_p0 }
   0x9   :  { %568 = shalt.err (!%p565_p4)  }
   0xa   :  { %s681_s18 = smov [#allocation4]  }
   0xb   :  { %12 = dma.vmem_to_smem %s10_s16, 16, %s681_s18, [#allocation2] }
   0xc   :  { %647 = dma.done.wait [#allocation2], 16 }
   0xd   :  { %648 = vsyncadd [#allocation2], 4294967280 }
   0xe   :  { %14 = sfence }
   0xf   :  { %15 = vsyncpa [#allocation6], 0 }
  0x10   :  { %17 = vsyncpa [#allocation6 + $0x1], 0 }
  0x11   :  { %18 = vsyncpa [#allocation7], 0 }
  0x12   :  { %20 = vsyncpa [#allocation7 + $0x1], 0  ;;  %s716_s0 = smov 0   ;;  %s718_s1 = smov 0  }
  0x13   :  { %s720_s19 = smov 0   ;;  %s722_s20 = smov 0  }
  0x14   :  { %s724_s21 = smov 0   ;;  %s726_s22 = smov 0  }
  0x15 LB: > { %s449_s23 = sadd.s32 4294967295, %s679_s22   ;;  %s450_s24 = sadd.s32 4294967294, %s679_s22   ;;  %s679_s22 = sphi %s726_s22, %s26_s22   ;;  %s675_s21 = sphi %s724_s21, %s900_s21   ;;  %s671_s20 = sphi %s722_s20, %s899_s20   ;;  %s667_s19 = sphi %s720_s19, %s898_s19   ;;  %s663_s1 = sphi %s718_s1, %s897_s1   ;;  %s659_s0 = sphi %s716_s0, %s896_s0  }
  0x16   : > { %s35_s25 = sadd.s32 1, %s675_s21  ;;  %s47_s26 = sadd.s32 1, %s667_s19 }
  0x17   : > { %p36_p5 = scmp.ge.s32.totalorder %s35_s25, 2  ;;  %p54_p6 = scmp.ne.s32.totalorder %s667_s19, %s663_s1 }
  0x18   : > { %p55_p7 = scmp.eq.s32.totalorder %s679_s22, 0  ;;  %p60_p8 = scmp.ne.s32.totalorder %s663_s1, %s659_s0 }
  0x19   : > { %s902_s25 = smov (%p36_p5, %s35_s25), 0  ;;  %p61_p10 = scmp.eq.s32.totalorder %s449_s23, 0 }
  0x1a   : > { %p757_p9 = por %p55_p7, %p54_p6  ;;  %s42_s28 = ssub.s32 %s675_s21, %s902_s25 }
  0x1b   : > { %p86_p11 = scmp.eq.s32.totalorder %s449_s23, 1  ;;  %p45_p12 = scmp.eq.s32.totalorder %s42_s28, 0 }
  0x1c   : > { %p763_p13 = por %p61_p10, %p60_p8  ;;  %p92_p1 = scmp.eq.s32.totalorder %s450_s24, 1 }
  0x1d   : > { %p767_p0 = por %p86_p11, %p54_p6  ;;  %p490_p4 = scmp.lt.s32.totalorder %s679_s22, 2 }
  0x1e   : > { %s772_s4 = scalar_select %p45_p12, %s667_s19, %s47_s26  }
  0x1f   : > { %p774_p2 = por %p92_p1, %p60_p8  ;;  %s112_s6 = sand.u32 1, %s667_s19  }
  0x20   : > { %s453_s7 = sshll.u32 %s112_s6, 3  ;;  %s454_s8 = sshll.u32 %s675_s21, 7 }
  0x21   : > { %s892_s5 = scalar_select %p774_p2, 1, 0 }
  0x22   : > { %s122_s11 = scalar_lea.hbm %s887_s2, %s454_s8  ;;  %s116_s12 = scalar_lea.vmem [#allocation5], %s453_s7 }
  0x23   : > { %s124_s13 = sshll.u32 %s116_s12, 4  ;;  %p787_p5 = pnand %p490_p4, %p757_p9  ;;  %s125_s13 = int_to_ptr.vmem [resolvable:$true] %s124_s13 }
  0x24   : > { %p455_p6 = scmp.ge.s32.totalorder %s679_s22, 1  ;;  %p129_p7 = scmp.lt.s32.totalorder %s679_s22, 3 }
  0x25   : > { %s113_s15 = scalar_lea.sflag [#allocation6], %s112_s6  ;;  %p571_p8 = pneg %p787_p5 }
  0x26   : > { %s582_s16 = scalar_lea.vmem %s125_s13, 128  ;;  %s682_s17 = smov [#allocation5]  }
  0x27   : > { %p583_p10 = scmp.ne.s32.totalorder %s125_s13, %s582_s16  ;;  %s587_s18 = sshll.u32 %s682_s17, 4  ;;  %s588_s18 = int_to_ptr.vmem [resolvable:$false] %s587_s18 }
  0x28   : > { %s589_s23 = scalar_lea.vmem %s588_s18, 256  ;;  %p590_p1 = scmp.lt.s32.totalorder %s125_s13, %s588_s18 }
  0x29   : > { %p585_p11 = pnand %p583_p10, %p571_p8  ;;  %p591_p3 = scmp.lt.s32.totalorder %s589_s23, %s582_s16 }
  0x2b   : > { %p586_p12 = pneg %p585_p11  ;;  %p592_p9 = por %p591_p3, %p590_p1 }
  0x2d   : > { %p593_p4 = pnand %p592_p9, %p586_p12 }
  0x2f   : > { %596 = shalt.err (!%p593_p4)
}
  0x30   : > { %485 = dma.hbm_to_vmem [thread:$0]  (!%p787_p5), %s122_s11, 128, %s125_s13, %s113_s15  }
  0x31   : > { %p130_p2 = pnand %p455_p6, %p129_p7 }
  0x32   : > { %s802_s24 = sand.u32 (!%p130_p2), 1, %s663_s1  }
  0x33   : > { %133 = sbr.rel (%p130_p2) target bundleno = 257 (0x101), region = 24  ;;  %s456_s26 = sshll.u32 (!%p130_p2), %s802_s24, 3 }
  0x34   : > { %s136_s27 = scalar_lea.sflag (!%p130_p2), [#allocation6], %s802_s24  ;;  %s806_s28 = scalar_lea.vmem (!%p130_p2), [#allocation5], %s456_s26 }
  0x38   : > { %650 = dma.done.wait (%p763_p13), %s136_s27, 128  }
  0x39   : > { %652 = vsyncadd (%p763_p13), %s136_s27, 4294967168  ;;  %s158_s6 = sld [smem:[#allocation4 + %s671_s20]]  ;;  %s813_s7 = scalar_lea.vmem [#allocation8], %s456_s26 }
  0x3f   : > { %p458_p2 = scmp.ne.s32.totalorder %s158_s6, 0 }
  0x41   : > { %163 = sbr.rel (%p458_p2) target bundleno = 72 (0x48), region = 32 }
  0x46   : > { %v164_v0 = vld [vmem:[%s806_s28] sm:$0xff] }
  0x47   : > { %165 = vst [vmem:[%s813_s7] sm:$0xff] %v164_v0 }
  0x48 PF: > { %p459_p3 = scmp.eq.s32.totalorder %s158_s6, 0 }
  0x49   : > { %s169_s8 = sld [smem:[#allocation3]] (!%p459_p3)  ;;  %s171_s9 = smul.u32 (!%p459_p3), 2654435761, %s671_s20 }
  0x4a   : > { %168 = sbr.rel (%p459_p3) target bundleno = 234 (0xea), region = 36 }
  0x4f   : > { %s170_s10 = sadd.s32 1, %s169_s8  ;;  %v184_v1 = vlaneseq  ;;  %v683_v37 = vmov 683565275   ;;  %v684_v39 = vmov 2475754826  }
  0x50   : > { %s172_s29 = sxor.u32 %s171_s9, %s170_s10  ;;  %v685_v41 = vmov 2131351028   ;;  %v686_v43 = vmov 2102212464   ;;  %v687_v45 = vmov 920167782  }
  0x51   : > { %s173_s11 = sshra.s32 %s172_s29, 16  ;;  %v185_v2 = vshrl.u32 %v184_v1, 7  ;;  %v187_v3 = vand.u32 127, %v184_v1  ;;  %v688_v54 = vmov 1326507024  }
  0x52   : > { %s174_s12 = sand.u32 65535, %s173_s11 }
  0x53   : > { %s175_s13 = sxor.u32 %s174_s12, %s172_s29  ;;  %v191_v4 = vshll.u32 %v185_v2, 7 }
  0x54   : > { %s176_s14 = smul.u32 2146121005, %s175_s13 }
  0x55   : > { %v192_v5 = vor.u32 %v191_v4, %v187_v3 }
  0x56   : > { %s177_s15 = sshra.s32 %s176_s14, 15 }
  0x57   : > { %s178_s16 = sand.u32 131071, %s177_s15 }
  0x58   : > { %s179_s17 = sxor.u32 %s178_s16, %s176_s14 }
  0x59   : > { %s180_s18 = smul.u32 2221713035, %s179_s17 }
  0x5b   : > { %s181_s23 = sshra.s32 %s180_s18, 16 }
  0x5c   : > { %s182_s26 = sand.u32 65535, %s181_s23 }
  0x5d   : > { %s183_s27 = sxor.u32 %s182_s26, %s180_s18 }
  0x5e   : > { %v193_v6 = vstv %s183_s27 }
  0x5f   : > { %v194_v7 = vxor.u32 %v193_v6, %v192_v5 }
  0x61   : > { %v206_v8 = vxor.u32 2246822507, %v194_v7  ;;  %v460_v13 = vshrl.u32 %v194_v7, 16 }
  0x63   : > { %v463_v9 = vshrl.u32 %v206_v8, 16  ;;  %v197_v16 = vxor.u32 %v460_v13, %v194_v7 }
  0x65   : > { %v209_v10 = vxor.u32 %v463_v9, %v206_v8  ;;  %v198_v19 = vmul.u32 2146121005, %v197_v16 }
  0x67   : > { %v210_v11 = vmul.u32 2146121005, %v209_v10  ;;  %v461_v22 = vshrl.u32 %v198_v19, 15 }
  0x69   : > { %v464_v12 = vshrl.u32 %v210_v11, 15  ;;  %v201_v25 = vxor.u32 %v461_v22, %v198_v19 }
  0x6b   : > { %v213_v14 = vxor.u32 %v464_v12, %v210_v11  ;;  %v202_v28 = vmul.u32 2221713035, %v201_v25 }
  0x6d   : > { %v214_v15 = vmul.u32 2221713035, %v213_v14  ;;  %v462_v32 = vshrl.u32 %v202_v28, 16 }
  0x6f   : > { %v465_v17 = vshrl.u32 %v214_v15, 16  ;;  %v205_v47 = vxor.u32 %v462_v32, %v202_v28 }
  0x71   : > { %v217_v18 = vxor.u32 %v465_v17, %v214_v15  ;;  %v218_v61 = vand.u32 16777215, %v205_v47 }
  0x73   : > { %v222_v20 = vand.u32 16777215, %v217_v18  ;;  %v219_v13 = vcvt.s32.f32 %v218_v61 }
  0x75   : > { %v223_v21 = vcvt.s32.f32 %v222_v20  ;;  %v220_v18 = vadd.f32 1.0, %v219_v13  ;;  %v351_v13 = vld [vmem:[%s806_s28 + $0x4] sm:$0xf] }
  0x77   : > { %v818_v23 = vmul.f32 3.7450704e-07, %v223_v21  ;;  %v221_v21 = vmul.f32 5.9604645e-08, %v220_v18 }
  0x79   : > { %v238_v24 = vand.u32 2139095040, %v818_v23  ;;  %v235_v29 = vand.u32 2147483647, %v818_v23  ;;  %547 = vlog2.f32 %v221_v21  ;;  %vm237_vm7 = vcmp.lt.s32.totalorder %v818_v23, 0 }
  0x7a   : > { %vm327_vm14 = vweird.f32 %v818_v23  ;;  %vm343_vm15 = vcmp.lt.f32.partialorder %v818_v23, 3.1415927 }
  0x7b   : > { %v239_v26 = vshrl.u32 %v238_v24, 23  ;;  %v242_v33 = vand.u32 8388607, %v235_v29  ;;  %vm236_vm8 = vcmp.le.f32.partialorder %v235_v29, 0.7853982 }
  0x7d   : > { %v466_v27 = vadd.s32 4294967169, %v239_v26  ;;  %v243_v48 = vor.u32 8388608, %v242_v33 }
  0x7f   : > { %v245_v30 = vadd.s32 1, %v466_v27  ;;  %v283_v62 = vshll.u32 %v243_v48, 8 }
  0x81   : > { %vm246_vm0 = vcmp.gt.s32.totalorder %v245_v30, 0 }
  0x82   : > { %v247_v31 = vsel %vm246_vm0, %v245_v30, 0 }
  0x83   : > { %v249_v34 = vand.u32 31, %v247_v31  ;;  %v248_v35 = vshrl.u32 %v247_v31, 5 }
  0x85   : > { %v250_v36 = vsub.s32 32, %v249_v34  ;;  %v252_v38 = vshll.u32 %v683_v37, %v249_v34  ;;  %v255_v40 = vshll.u32 %v684_v39, %v249_v34  ;;  %v258_v42 = vshll.u32 %v685_v41, %v249_v34 }
  0x86   : > { %v261_v44 = vshll.u32 %v686_v43, %v249_v34  ;;  %v264_v46 = vshll.u32 %v687_v45, %v249_v34  ;;  %vm267_vm1 = vcmp.lt.s32.totalorder %v248_v35, 1  ;;  %vm270_vm2 = vcmp.lt.s32.totalorder %v248_v35, 4  ;;  %v548_v33 = vpop.eup %547 }
  0x87   : > { %v253_v49 = vshrl.u32 %v684_v39, %v250_v36  ;;  %v256_v50 = vshrl.u32 %v685_v41, %v250_v36  ;;  %v251_v51 = vshrl.u32 %v683_v37, %v250_v36  ;;  %v259_v52 = vshrl.u32 %v686_v43, %v250_v36 }
  0x88   : > { %v262_v53 = vshrl.u32 %v687_v45, %v250_v36  ;;  %v265_v55 = vshrl.u32 %v688_v54, %v250_v36  ;;  %vm269_vm3 = vcmp.lt.s32.totalorder %v248_v35, 3  ;;  %vm268_vm4 = vcmp.lt.s32.totalorder %v248_v35, 2 }
  0x89   : > { %v254_v56 = vor.u32 %v253_v49, %v252_v38  ;;  %v257_v57 = vor.u32 %v256_v50, %v255_v40  ;;  %v260_v58 = vor.u32 %v259_v52, %v258_v42  ;;  %v226_v38 = vmul.f32 0.6931472, %v548_v33 }
  0x8a   : > { %v263_v59 = vor.u32 %v262_v53, %v261_v44  ;;  %v266_v60 = vor.u32 %v265_v55, %v264_v46 }
  0x8b   : > { %v271_v63 = vsel %vm267_vm1, %v251_v51, %v254_v56  ;;  %v272_v0 = vsel %vm270_vm2, %v260_v58, 2102212464  ;;  %v275_v1 = vsel %vm267_vm1, %v254_v56, %v257_v57  ;;  %v279_v5 = vsel %vm267_vm1, %v257_v57, %v260_v58 }
  0x8c   : > { %v276_v2 = vsel %vm270_vm2, %v263_v59, 920167782  ;;  %v273_v3 = vsel %vm269_vm3, %v257_v57, %v272_v0  ;;  %v280_v6 = vsel %vm270_vm2, %v266_v60, 1326507024  ;;  %v227_v43 = vmul.f32 -2.0, %v226_v38 }
  0x8d   : > { %v277_v4 = vsel %vm269_vm3, %v260_v58, %v276_v2  ;;  %v281_v8 = vsel %vm269_vm3, %v263_v59, %v280_v6  ;;  %v274_v9 = vsel %vm268_vm4, %v271_v63, %v273_v3  ;;  %v348_v3 = vld [vmem:[%s806_s28] sm:$0xf] }
  0x8e   : > { %v278_v7 = vsel %vm268_vm4, %v275_v1, %v277_v4  ;;  %v282_v10 = vsel %vm268_vm4, %v279_v5, %v281_v8  ;;  %v290_v16 = vmul.u32 %v283_v62, %v274_v9  ;;  %549 = vrsqrt.f32 %v227_v43 }
  0x8f   : > { %v824_v11 = vmul.u32.u64.low %v283_v62, %v278_v7  ;;  %v825_v12 = vmul.u32.u64.high %v283_v62, %v278_v7, %v824_v11  ;;  %v827_v14 = vmul.u32.u64.low %v283_v62, %v282_v10  ;;  %v828_v15 = vmul.u32.u64.high %v283_v62, %v282_v10, %v827_v14 }
  0x90   : > { %vm230_vm9 = vcmp.eq.f32.partialorder %v227_v43, inf  ;;  %v233_v58 = vand.u32 2147483648, %v227_v43  ;;  %vm232_vm11 = vcmp.eq.f32.partialorder %v227_v43, 0.0 }
  0x91   : > { %v293_v17 = vadd.s32 1, %v825_v12  ;;  %vm292_vm5 = vc.u32 %v828_v15, %v824_v11  ;;  %v291_v32 = vadd.s32 %v824_v11, %v828_v15 }
  0x93   : > { %v294_v19 = vsel %vm292_vm5, %v293_v17, %v825_v12 }
  0x94   : > { %v295_v20 = vadd.s32 %v294_v19, %v290_v16 }
  0x96   : > { %v296_v22 = vadd.s32 536870912, %v295_v20 }
  0x98   : > { %v297_v24 = vshrl.u32 %v296_v22, 30 }
  0x9a   : > { %v298_v25 = vshll.u32 %v297_v24, 30  ;;  %v321_v50 = vsub.s32 4, %v297_v24 }
  0x9b   : > { %v550_v54 = vpop.eup %549 }
  0x9c   : > { %v299_v26 = vsub.s32 %v295_v20, %v298_v25  ;;  %v322_v52 = vsel %vm237_vm7, %v321_v50, %v297_v24  ;;  %v229_v56 = vmul.f32 %v550_v54, %v227_v43 }
  0x9d   : > { %v324_v53 = vsel %vm236_vm8, 0, %v322_v52 }
  0x9e   : > { %v301_v27 = vsub.s32 0, %v299_v26  ;;  %v328_v55 = vand.u32 3, %v324_v53  ;;  %v231_v60 = vsel %vm230_vm9, %v227_v43, %v229_v56 }
  0x9f   : > { %v234_v63 = vsel %vm232_vm11, %v233_v58, %v231_v60 }
  0xa0   : > { %v467_v28 = vmin.u32 %v301_v27, %v299_v26  ;;  %vm333_vm10 = vcmp.eq.s32.totalorder %v328_v55, 2  ;;  %vm330_vm12 = vcmp.eq.s32.totalorder %v328_v55, 0  ;;  %vm329_vm13 = vcmp.lt.s32.totalorder %v328_v55, 2 }
  0xa2   : > { %v303_v30 = vclz %v467_v28 }
  0xa4   : > { %v468_v31 = vadd.s32 4294967294, %v303_v30 }
  0xa6   : > { %vm469_vm6 = vcmp.lt.s32.totalorder %v468_v31, 0 }
  0xa7   : > { %v306_v34 = vsel %vm469_vm6, 0, %v468_v31 }
  0xa8   : > { %v307_v35 = vsub.s32 32, %v306_v34  ;;  %v308_v36 = vshll.u32 %v299_v26, %v306_v34  ;;  %v311_v37 = vsub.s32 4294967266, %v306_v34 }
  0xaa   : > { %v309_v39 = vshrl.u32 %v291_v32, %v307_v35  ;;  %v312_v40 = vadd.s32 127, %v311_v37 }
  0xac   : > { %v310_v41 = vor.u32 %v309_v39, %v308_v36  ;;  %v313_v42 = vshll.u32 %v312_v40, 23 }
  0xae   : > { %v314_v44 = vor.u32 4788187, %v313_v42  ;;  %v317_v45 = vcvt.s32.f32 %v310_v41 }
  0xb0   : > { %v315_v46 = vand.u32 2147483647, %v314_v44 }
  0xb2   : > { %v318_v47 = vmul.f32 %v317_v45, %v315_v46 }
  0xb4   : > { %v319_v48 = vxor.u32 2147483648, %v318_v47 }
  0xb6   : > { %v320_v49 = vsel %vm237_vm7, %v319_v48, %v318_v47 }
  0xb7   : > { %v323_v51 = vsel %vm236_vm8, %v818_v23, %v320_v49 }
  0xb8   : > { %551 = vcosq.f32 %v323_v51 }
  0xb9   : > { %553 = vsinq.f32 %v323_v51 }
  0xc5   : > { %v552_v57 = vpop.eup %551 }
  0xc6   : > { %v554_v59 = vpop.eup %553  ;;  %v334_v29 = vxor.u32 2147483648, %v552_v57 }
  0xc7   : > { %v331_v61 = vxor.u32 2147483648, %v554_v59 }
  0xc8   : > { %v335_v62 = vsel %vm333_vm10, %v334_v29, %v554_v59 }
  0xc9   : > { %v332_v0 = vsel %vm330_vm12, %v552_v57, %v331_v61 }
  0xca   : > { %v336_v1 = vsel %vm329_vm13, %v332_v0, %v335_v62 }
  0xcb   : > { %v337_v2 = vsel %vm327_vm14, nan, %v336_v1 }
  0xcc   : > { %v338_v4 = vmul.f32 %v337_v2, %v337_v2  ;;  %v346_v5 = vmul.f32 %v337_v2, %v234_v63 }
  0xce   : > { %v339_v6 = vsub.f32 1.0, %v338_v4  ;;  %v349_v7 = vadd.f32 %v348_v3, %v346_v5 }
  0xd0   : > { %v340_v8 = vmax.f32 %v339_v6, 1e-30  ;;  %350 = vst [vmem:[%s813_s7] sm:$0xf] %v349_v7 }
  0xd2   : > { %555 = vrsqrt.f32 %v340_v8 }
  0xdf   : > { %v556_v9 = vpop.eup %555 }
  0xe0   : > { %v342_v10 = vmul.f32 %v556_v9, %v340_v8 }
  0xe2   : > { %v344_v11 = vsub.f32 0.0, %v342_v10 }
  0xe4   : > { %v345_v12 = vsel %vm343_vm15, %v342_v10, %v344_v11 }
  0xe5   : > { %v347_v14 = vmul.f32 %v345_v12, %v234_v63 }
  0xe7   : > { %v352_v15 = vadd.f32 %v351_v13, %v347_v14 }
  0xe9   : > { %353 = vst [vmem:[%s813_s7 + $0x4] sm:$0xf] %v352_v15 }
  0xea PF: > { %s471_s6 = sshll.u32 %s671_s20, 7  ;;  %s369_s29 = sshll.u32 %s813_s7, 4  ;;  %s370_s29 = int_to_ptr.vmem [resolvable:$true] %s369_s29 }
  0xeb   : > { %s367_s10 = scalar_lea.hbm %s888_s3, %s471_s6  ;;  %s355_s11 = scalar_lea.sflag [#allocation7], %s802_s24 }
  0xec   : > { %s597_s12 = scalar_lea.vmem %s370_s29, 128  ;;  %s689_s28 = smov [#allocation8]  }
  0xed   : > { %p598_p13 = scmp.ne.s32.totalorder %s370_s29, %s597_s12  ;;  %s601_s13 = sshll.u32 %s689_s28, 4  ;;  %s602_s13 = int_to_ptr.vmem [resolvable:$false] %s601_s13 }
  0xee   : > { %s603_s14 = scalar_lea.vmem %s602_s13, 256  ;;  %p604_p7 = scmp.lt.s32.totalorder %s370_s29, %s602_s13 }
  0xef   : > { %p599_p5 = pnand %p598_p13, %p767_p0  ;;  %p605_p8 = scmp.lt.s32.totalorder %s603_s14, %s597_s12 }
  0xf1   : > { %p600_p6 = pneg %p599_p5  ;;  %p606_p10 = por %p605_p8, %p604_p7 }
  0xf3   : > { %p607_p11 = pnand %p606_p10, %p600_p6 }
  0xf5   : > { %610 = shalt.err (!%p607_p11)
}
  0xf6   : > { %s611_s20 = scalar_lea.hbm %s367_s10, 128  ;;  %s615_s15 = scalar_lea.hbm %s888_s3, 256 }
  0xf7   : > { %p612_p12 = scmp.ne.s32.totalorder %s367_s10, %s611_s20  ;;  %p616_p4 = scmp.lt.s32.totalorder %s367_s10, %s888_s3 }
  0xf8   : > { %p617_p2 = scmp.lt.s32.totalorder %s615_s15, %s611_s20 }
  0xf9   : > { %p613_p1 = pnand %p612_p12, %p767_p0 }
  0xfa   : > { %p618_p3 = por %p617_p2, %p616_p4 }
  0xfb   : > { %p614_p9 = pneg %p613_p1 }
  0xfd   : > { %p619_p13 = pnand %p618_p3, %p614_p9 }
  0xff   : > { %622 = shalt.err (!%p619_p13)
}
 0x100   : > { %480 = dma.vmem_to_hbm [thread:$0]  (%p767_p0), %s370_s29, 128, %s367_s10, %s355_s11  }
 0x101 PF: > { %s381_s18 = sand.u32 1, %s659_s0   ;;  %p894_p5 = scmp.ne.s32.totalorder %s892_s5, 0 }
 0x102   : > { %p895_p6 = scmp.ge.s32.totalorder %s679_s22, 2  ;;  %s382_s23 = scalar_lea.sflag [#allocation7], %s381_s18 }
 0x104   : > { %p487_p7 = pnand %p895_p6, %p894_p5 }
 0x106   : > { %p488_p8 = pneg %p487_p7 }
 0x108   : > { %654 = dma.done.wait (%p488_p8), %s382_s23, 128  }
 0x109   : > { %656 = vsyncadd (%p488_p8), %s382_s23, 4294967168  ;;  %s26_s22 = sadd.s32 1, %s679_s22   ;;  %s896_s0 = smov %s663_s1 }
 0x10a   : > { %p23_p10 = scmp.ge.s32.totalorder %s26_s22, 4   ;;  %s897_s1 = smov %s667_s19 }
 0x10b   : > { %s898_s19 = smov %s772_s4  ;;  %s899_s20 = smov %s675_s21 }
 0x10c   : > { %s900_s21 = smov %s902_s25  ;;  %25 = sbr.rel (!%p23_p10) target bundleno = 21 (0x15), region = 77 }
 0x111   :  { %387 = vsyncpa [#allocation6], 1 }
 0x112   :  { %389 = vsyncpa [#allocation6 + $0x1], 1 }
 0x113   :  { %390 = vsyncpa [#allocation7], 1 }
 0x114   :  { %392 = vsyncpa [#allocation7 + $0x1], 1 }

</bundles_post_ra>
